<compile_context>
chip_gen: v5e
topology: v5e:2x2
jax: 0.10.0
libtpu: 0.0.40
codegen_flags: <defaults>
</compile_context>

<pallas_src>
import functools
import math

import numpy as np

import jax
import jax.numpy as jnp
from jax.experimental import pallas as pl
from jax.experimental.pallas import tpu as pltpu

_TM_CAP, _TK_CAP, _TN_CAP = 256, 512, 256
_BN_EPS = 1e-5


# ----------------------------------------------------------------------------
# Pallas kernels
# ----------------------------------------------------------------------------
def _matmul_kernel(x_ref, w_ref, b_ref, o_ref, acc_ref, *, act):
    """Tiled Y = X @ W + b with optional LeakyReLU(0.2) / Sigmoid epilogue."""
    k = pl.program_id(2)

    @pl.when(k == 0)
    def _():
        acc_ref[...] = jnp.zeros_like(acc_ref)

    acc_ref[...] += jnp.dot(x_ref[...], w_ref[...],
                            preferred_element_type=jnp.float32)

    @pl.when(k == pl.num_programs(2) - 1)
    def _():
        y = acc_ref[...] + b_ref[...]
        if act == "leaky_relu":
            y = jnp.where(y > 0, y, 0.2 * y)
        elif act == "sigmoid":
            y = 1.0 / (1.0 + jnp.exp(-y))
        o_ref[...] = y.astype(o_ref.dtype)


def _matmul_bn_lrelu_kernel(x_ref, w_ref, b_ref, g_ref, be_ref, o_ref, acc_ref,
                            *, eps):
    """Tiled Y = LeakyReLU(BN(X @ W + b)); BN uses batch stats over all rows.

    Requires the whole M dimension to live in this single block (grid_m == 1,
    no M padding) so that the per-channel mean/variance are exact.
    """
    k = pl.program_id(2)

    @pl.when(k == 0)
    def _():
        acc_ref[...] = jnp.zeros_like(acc_ref)

    acc_ref[...] += jnp.dot(x_ref[...], w_ref[...],
                            preferred_element_type=jnp.float32)

    @pl.when(k == pl.num_programs(2) - 1)
    def _():
        y = acc_ref[...] + b_ref[...]
        mean = jnp.mean(y, axis=0, keepdims=True)
        var = jnp.mean((y - mean) * (y - mean), axis=0, keepdims=True)  # biased
        y = (y - mean) * jax.lax.rsqrt(var + eps) * g_ref[...] + be_ref[...]
        o_ref[...] = jnp.where(y > 0, y, 0.2 * y).astype(o_ref.dtype)


def _bn_lrelu_kernel(x_ref, g_ref, b_ref, o_ref, *, eps):
    """Standalone BatchNorm (batch stats over rows) + LeakyReLU fallback."""
    x = x_ref[...].astype(jnp.float32)
    mean = jnp.mean(x, axis=0, keepdims=True)
    var = jnp.mean((x - mean) * (x - mean), axis=0, keepdims=True)
    y = (x - mean) * jax.lax.rsqrt(var + eps) * g_ref[...] + b_ref[...]
    o_ref[...] = jnp.where(y > 0, y, 0.2 * y).astype(o_ref.dtype)


# ----------------------------------------------------------------------------
# Pallas wrappers
# ----------------------------------------------------------------------------
def _ceil_to(x, m):
    return ((x + m - 1) // m) * m


def _pad2(a, rows, cols):
    r, c = a.shape
    if r == rows and c == cols:
        return a
    return jnp.pad(a, ((0, rows - r), (0, cols - c)))


def bn_lrelu_pallas(x, gamma, beta, *, eps=_BN_EPS, out_dtype=jnp.float32):
    """Fallback BN+LeakyReLU over (M, C) channels-last rows (single block)."""
    M, C = x.shape
    gp = gamma.reshape(1, C).astype(jnp.float32)
    bp = beta.reshape(1, C).astype(jnp.float32)
    return pl.pallas_call(
        functools.partial(_bn_lrelu_kernel, eps=eps),
        out_shape=jax.ShapeDtypeStruct((M, C), out_dtype),
        in_specs=[
            pl.BlockSpec((M, C), lambda: (0, 0)),
            pl.BlockSpec((1, C), lambda: (0, 0)),
            pl.BlockSpec((1, C), lambda: (0, 0)),
        ],
        out_specs=pl.BlockSpec((M, C), lambda: (0, 0)),
    )(x, gp, bp)


def matmul_pallas(x, w, b, *, act=None, bn=None, eps=_BN_EPS,
                  out_dtype=jnp.float32):
    """Fused Y = epi(X @ W + b) on the MXU.

    x: (M, K), w: (K, N), b: (N,). Operands feed the MXU as bf16; the
    accumulator and epilogue are f32. `bn=(gamma, beta)` fuses training-mode
    BatchNorm + LeakyReLU(0.2); otherwise `act` in {None, "leaky_relu",
    "sigmoid"} is fused. Returns (M, N) in `out_dtype`.
    """
    M, K = x.shape
    K2, N = w.shape
    assert K2 == K

    # Tile = full dim when it fits (no padding of small K/N), else capped
    # aligned tiles (tm%8==0, tk%128==0, tn%128==0).
    tm = M if M <= _TM_CAP else _TM_CAP
    tk = K if K <= _TK_CAP else _TK_CAP
    tn = N if N <= _TN_CAP else _TN_CAP
    Mp, Kp, Np = _ceil_to(M, tm), _ceil_to(K, tk), _ceil_to(N, tn)
    gm, gn, gk = Mp // tm, Np // tn, Kp // tk

    fuse_bn = (bn is not None) and gm == 1 and Mp == M
    mm_dtype = jnp.float32 if (bn is not None and not fuse_bn) else out_dtype

    xp = _pad2(x.astype(jnp.bfloat16), Mp, Kp)
    wp = _pad2(w.astype(jnp.bfloat16), Kp, Np)
    bp = _pad2(b.reshape(1, N).astype(jnp.float32), 1, Np)

    in_specs = [
        pl.BlockSpec((tm, tk), lambda i, j, k: (i, k)),
        pl.BlockSpec((tk, tn), lambda i, j, k: (k, j)),
        pl.BlockSpec((1, tn), lambda i, j, k: (0, j)),
    ]
    operands = [xp, wp, bp]

    if fuse_bn:
        gamma, beta = bn
        gp = _pad2(gamma.reshape(1, N).astype(jnp.float32), 1, Np)
        bep = _pad2(beta.reshape(1, N).astype(jnp.float32), 1, Np)
        in_specs += [pl.BlockSpec((1, tn), lambda i, j, k: (0, j)),
                     pl.BlockSpec((1, tn), lambda i, j, k: (0, j))]
        operands += [gp, bep]
        kernel = functools.partial(_matmul_bn_lrelu_kernel, eps=eps)
    else:
        kernel = functools.partial(_matmul_kernel,
                                   act=None if bn is not None else act)

    out = pl.pallas_call(
        kernel,
        out_shape=jax.ShapeDtypeStruct((Mp, Np), mm_dtype),
        grid_spec=pltpu.PrefetchScalarGridSpec(
            num_scalar_prefetch=0,
            grid=(gm, gn, gk),
            in_specs=in_specs,
            out_specs=pl.BlockSpec((tm, tn), lambda i, j, k: (i, j)),
            scratch_shapes=[pltpu.VMEM((tm, tn), jnp.float32)],
        ),
        compiler_params=pltpu.CompilerParams(
            dimension_semantics=("parallel", "parallel", "arbitrary"),
            vmem_limit_bytes=32 * 1024 * 1024,
        ),
    )(*operands)

    out = out[:M, :N]
    if bn is not None and not fuse_bn:
        out = bn_lrelu_pallas(out, bn[0], bn[1], eps=eps, out_dtype=out_dtype)
    return out


# ----------------------------------------------------------------------------
# Layer helpers (channels-last; only tiny XLA glue outside the kernels)
# ----------------------------------------------------------------------------
def conv2d_nhwc(x, w, b, *, stride, padding, act=None, bn=None,
                out_dtype=jnp.float32):
    """x: (N, H, W, Cin) NHWC; w: PyTorch OIHW (O, Cin, kh, kw); b: (O,)."""
    N, H, W, Cin = x.shape
    O, _, kh, kw = w.shape
    OH = (H + 2 * padding - kh) // stride + 1
    OW = (W + 2 * padding - kw) // stride + 1

    xp = jnp.pad(x, ((0, 0), (padding, padding), (padding, padding), (0, 0)))
    # TODO(synk): the stride-4 patch gather stays as XLA strided slices — it
    # is not cleanly expressible via BlockSpec index_map offsets alone.
    cols = [xp[:, i:i + stride * OH:stride, j:j + stride * OW:stride, :]
            for i in range(kh) for j in range(kw)]
    patches = jnp.concatenate(cols, axis=-1).reshape(N * OH * OW, kh * kw * Cin)

    wmat = jnp.transpose(w, (2, 3, 1, 0)).reshape(kh * kw * Cin, O)
    y = matmul_pallas(patches, wmat, b, act=act, bn=bn, out_dtype=out_dtype)
    return y.reshape(N, OH, OW, O)


def avgpool_sigmoid_nhwc(x, *, ksize, stride, padding):
    """AvgPool2d(ksize, stride, padding) (count_include_pad) + Sigmoid.

    Expressed as one fused Pallas matmul: flatten (H,W,C), multiply by
    kron(P.T, I_C) where P is the (OH*OW, H*W) pooling matrix.
    """
    N, H, W, C = x.shape
    OH = (H + 2 * padding - ksize) // stride + 1
    OW = (W + 2 * padding - ksize) // stride + 1

    P = np.zeros((OH * OW, H * W), np.float32)
    inv = 1.0 / float(ksize * ksize)          # divide by k*k incl. padding
    for oh in range(OH):
        for ow in range(OW):
            for di in range(ksize):
                for dj in range(ksize):
                    h = oh * stride - padding + di
                    w_ = ow * stride - padding + dj
                    if 0 <= h < H and 0 <= w_ < W:
                        P[oh * OW + ow, h * W + w_] += inv
    w_pool = jnp.asarray(np.kron(P.T, np.eye(C, dtype=np.float32)))

    y = matmul_pallas(x.reshape(N, H * W * C), w_pool,
                      jnp.zeros((OH * OW * C,), jnp.float32),
                      act="sigmoid", out_dtype=jnp.float32)
    return y.reshape(N, OH, OW, C)


# ----------------------------------------------------------------------------
# Discriminator forward
# ----------------------------------------------------------------------------
def init_discriminator_params(key, channels, features):
    ks = jax.random.split(key, 3)

    def conv_init(k, o, i, ksz):
        fan_in = i * ksz * ksz
        bound = 1.0 / math.sqrt(fan_in)
        kw_, kb_ = jax.random.split(k)
        w = jax.random.uniform(kw_, (o, i, ksz, ksz), jnp.float32, -bound, bound)
        b = jax.random.uniform(kb_, (o,), jnp.float32, -bound, bound)
        return w, b

    F, C = features, channels
    w1, b1 = conv_init(ks[0], F, C, 3)
    w2, b2 = conv_init(ks[1], 4 * F, F, 3)
    w3, b3 = conv_init(ks[2], 8 * F, 4 * F, 3)
    return {
        "w1": w1, "b1": b1,
        "w2": w2, "b2": b2,
        "g2": jnp.ones((4 * F,), jnp.float32), "be2": jnp.zeros((4 * F,), jnp.float32),
        "w3": w3, "b3": b3,
        "g3": jnp.ones((8 * F,), jnp.float32), "be3": jnp.zeros((8 * F,), jnp.float32),
    }


def discriminator_forward(params, x_nchw):
    x = jnp.transpose(x_nchw, (0, 2, 3, 1))                   # NCHW -> NHWC once
    # layer 1: Conv(C -> F, s4) + LeakyReLU   (fused in one Pallas call)
    h = conv2d_nhwc(x, params["w1"], params["b1"], stride=4, padding=1,
                    act="leaky_relu", out_dtype=jnp.bfloat16)
    # block 1: Conv(F -> 4F, s4) + BatchNorm + LeakyReLU  (fused)
    h = conv2d_nhwc(h, params["w2"], params["b2"], stride=4, padding=1,
                    bn=(params["g2"], params["be2"]), out_dtype=jnp.bfloat16)
    # block 2: Conv(4F -> 8F, s4) + BatchNorm + LeakyReLU  (fused)
    h = conv2d_nhwc(h, params["w3"], params["b3"], stride=4, padding=1,
                    bn=(params["g3"], params["be3"]), out_dtype=jnp.bfloat16)
    # AvgPool2d(3, 4, 1) + Sigmoid  (fused)
    y = avgpool_sigmoid_nhwc(h, ksize=3, stride=4, padding=1)
    return jnp.transpose(y, (0, 3, 1, 2))                     # NHWC -> NCHW


if __name__ == "__main__":
    # Small shapes: batch=2, channels=4, spatial=16x16, features=8.
    # 16 -> 4 -> 1 -> 1 spatially; final output (2, 8*features, 1, 1).
    batch, channels, spatial, features = 2, 4, 16, 8

    key = jax.random.PRNGKey(0)
    k_x, k_p = jax.random.split(key)
    x = jax.random.normal(k_x, (batch, channels, spatial, spatial),
                          dtype=jnp.float32)
    params = init_discriminator_params(k_p, channels, features)

    out = jax.jit(discriminator_forward)(params, x)
    out = jax.block_until_ready(out)

    assert out.shape == (batch, features * 8, 1, 1), out.shape
    assert out.dtype == jnp.float32
    assert bool(jnp.all(jnp.isfinite(out)))
    assert bool(jnp.all((out >= 0.0) & (out <= 1.0)))  # sigmoid range
    print("KERNEL_OK")
</pallas_src>

<mosaic_0001>
module attributes {stable_mosaic.version = 11 : i64} {
  func.func @_matmul_kernel(%arg0: i32, %arg1: i32, %arg2: i32, %arg3: memref<32x36xbf16, #tpu.memory_space<vmem>>, %arg4: memref<36x8xbf16, #tpu.memory_space<vmem>>, %arg5: memref<1x8xf32, #tpu.memory_space<vmem>>, %arg6: memref<32x8xbf16, #tpu.memory_space<vmem>>, %arg7: memref<32x8xf32, #tpu.memory_space<vmem>>) attributes {dimension_semantics = [#tpu.dimension_semantics<parallel>, #tpu.dimension_semantics<parallel>, #tpu.dimension_semantics<arbitrary>], iteration_bounds = array<i64: 1, 1, 1>, scalar_prefetch = 0 : i64, scratch_operands = 1 : i64, tpu.core_type = #tpu.core_type<tc>, window_params = [{transform_indices = @transform_0, window_bounds = array<i64: 32, 36>}, {transform_indices = @transform_1, window_bounds = array<i64: 36, 8>}, {transform_indices = @transform_2, window_bounds = array<i64: 1, 8>}, {transform_indices = @transform_3, window_bounds = array<i64: 32, 8>}]} {
    %c0_i32 = arith.constant 0 : i32
    %0 = arith.cmpi eq, %arg2, %c0_i32 : i32
    %1 = arith.extui %0 : i1 to i32
    %c0_i32_0 = arith.constant 0 : i32
    %2 = arith.cmpi ne, %1, %c0_i32_0 : i32
    scf.if %2 {
      %cst_10 = arith.constant 0.000000e+00 : f32
      %12 = vector.broadcast %cst_10 : f32 to vector<32x8xf32>
      %c0_11 = arith.constant 0 : index
      %c0_12 = arith.constant 0 : index
      %13 = vector.load %arg7[%c0_11, %c0_12] : memref<32x8xf32, #tpu.memory_space<vmem>>, vector<32x8xf32>
      tpu.vector_store %arg7[%c0_11, %c0_12], %12 {strides = array<i32>} : memref<32x8xf32, #tpu.memory_space<vmem>>, vector<32x8xf32>,
    } else {
    }
    %c0 = arith.constant 0 : index
    %c0_1 = arith.constant 0 : index
    %3 = vector.load %arg7[%c0, %c0_1] : memref<32x8xf32, #tpu.memory_space<vmem>>, vector<32x8xf32>
    %c0_2 = arith.constant 0 : index
    %c0_3 = arith.constant 0 : index
    %4 = vector.load %arg3[%c0_2, %c0_3] : memref<32x36xbf16, #tpu.memory_space<vmem>>, vector<32x36xbf16>
    %c0_4 = arith.constant 0 : index
    %c0_5 = arith.constant 0 : index
    %5 = vector.load %arg4[%c0_4, %c0_5] : memref<36x8xbf16, #tpu.memory_space<vmem>>, vector<36x8xbf16>
    %cst = arith.constant dense<0.000000e+00> : vector<32x8xf32>
    %6 = tpu.matmul %4, %5, %cst {dimension_numbers = #tpu.dot_dimension_numbers<[1], [0], [0], [1], [0, 0, 1, 1], [], []>} : vector<32x36xbf16>, vector<36x8xbf16>, vector<32x8xf32> -> vector<32x8xf32>
    %7 = arith.addf %3, %6 : vector<32x8xf32>
    %c0_6 = arith.constant 0 : index
    %c0_7 = arith.constant 0 : index
    %8 = vector.load %arg7[%c0_6, %c0_7] : memref<32x8xf32, #tpu.memory_space<vmem>>, vector<32x8xf32>
    tpu.vector_store %arg7[%c0_6, %c0_7], %7 {strides = array<i32>} : memref<32x8xf32, #tpu.memory_space<vmem>>, vector<32x8xf32>,
    %c0_i32_8 = arith.constant 0 : i32
    %9 = arith.cmpi eq, %arg2, %c0_i32_8 : i32
    %10 = arith.extui %9 : i1 to i32
    %c0_i32_9 = arith.constant 0 : i32
    %11 = arith.cmpi ne, %10, %c0_i32_9 : i32
    scf.if %11 {
      %c0_10 = arith.constant 0 : index
      %c0_11 = arith.constant 0 : index
      %12 = vector.load %arg7[%c0_10, %c0_11] : memref<32x8xf32, #tpu.memory_space<vmem>>, vector<32x8xf32>
      %c0_12 = arith.constant 0 : index
      %c0_13 = arith.constant 0 : index
      %13 = vector.load %arg5[%c0_12, %c0_13] : memref<1x8xf32, #tpu.memory_space<vmem>>, vector<1x8xf32>
      %14 = vector.broadcast %13 : vector<1x8xf32> to vector<32x8xf32>
      %15 = arith.addf %12, %14 : vector<32x8xf32>
      %cst_14 = arith.constant 0.000000e+00 : f32
      %16 = vector.broadcast %cst_14 : f32 to vector<32x8xf32>
      %17 = arith.cmpf ogt, %15, %16 : vector<32x8xf32>
      %cst_15 = arith.constant 2.000000e-01 : f32
      %18 = vector.broadcast %cst_15 : f32 to vector<32x8xf32>
      %19 = arith.mulf %18, %15 : vector<32x8xf32>
      %20 = arith.select %17, %15, %19 : vector<32x8xi1>, vector<32x8xf32>
      %21 = arith.truncf %20 : vector<32x8xf32> to vector<32x8xbf16>
      %c0_16 = arith.constant 0 : index
      %c0_17 = arith.constant 0 : index
      %22 = vector.load %arg6[%c0_16, %c0_17] : memref<32x8xbf16, #tpu.memory_space<vmem>>, vector<32x8xbf16>
      tpu.vector_store %arg6[%c0_16, %c0_17], %21 {strides = array<i32>} : memref<32x8xbf16, #tpu.memory_space<vmem>>, vector<32x8xbf16>,
    } else {
    }
    return
  }
  func.func @transform_0(%arg0: i32, %arg1: i32, %arg2: i32) -> (i32, i32) {
    %c0_i32 = arith.constant 0 : i32
    return %arg0, %arg2 : i32, i32
  }
  func.func @transform_1(%arg0: i32, %arg1: i32, %arg2: i32) -> (i32, i32) {
    %c0_i32 = arith.constant 0 : i32
    return %arg2, %arg1 : i32, i32
  }
  func.func @transform_2(%arg0: i32, %arg1: i32, %arg2: i32) -> (i32, i32) {
    %c0_i32 = arith.constant 0 : i32
    %c0_i32_0 = arith.constant 0 : i32
    return %c0_i32, %arg1 : i32, i32
  }
  func.func @transform_3(%arg0: i32, %arg1: i32, %arg2: i32) -> (i32, i32) {
    %c0_i32 = arith.constant 0 : i32
    return %arg0, %arg1 : i32, i32
  }
}

module attributes {stable_mosaic.version = 11 : i64} {
  func.func @_matmul_bn_lrelu_kernel(%arg0: i32, %arg1: i32, %arg2: i32, %arg3: memref<2x72xbf16, #tpu.memory_space<vmem>>, %arg4: memref<72x32xbf16, #tpu.memory_space<vmem>>, %arg5: memref<1x32xf32, #tpu.memory_space<vmem>>, %arg6: memref<1x32xf32, #tpu.memory_space<vmem>>, %arg7: memref<1x32xf32, #tpu.memory_space<vmem>>, %arg8: memref<2x32xbf16, #tpu.memory_space<vmem>>, %arg9: memref<2x32xf32, #tpu.memory_space<vmem>>) attributes {dimension_semantics = [#tpu.dimension_semantics<parallel>, #tpu.dimension_semantics<parallel>, #tpu.dimension_semantics<arbitrary>], iteration_bounds = array<i64: 1, 1, 1>, scalar_prefetch = 0 : i64, scratch_operands = 1 : i64, tpu.core_type = #tpu.core_type<tc>, window_params = [{transform_indices = @transform_0, window_bounds = array<i64: 2, 72>}, {transform_indices = @transform_1, window_bounds = array<i64: 72, 32>}, {transform_indices = @transform_2, window_bounds = array<i64: 1, 32>}, {transform_indices = @transform_3, window_bounds = array<i64: 1, 32>}, {transform_indices = @transform_4, window_bounds = array<i64: 1, 32>}, {transform_indices = @transform_5, window_bounds = array<i64: 2, 32>}]} {
    %c0_i32 = arith.constant 0 : i32
    %0 = arith.cmpi eq, %arg2, %c0_i32 : i32
    %1 = arith.extui %0 : i1 to i32
    %c0_i32_0 = arith.constant 0 : i32
    %2 = arith.cmpi ne, %1, %c0_i32_0 : i32
    scf.if %2 {
      %cst_10 = arith.constant 0.000000e+00 : f32
      %12 = vector.broadcast %cst_10 : f32 to vector<2x32xf32>
      %c0_11 = arith.constant 0 : index
      %c0_12 = arith.constant 0 : index
      %13 = vector.load %arg9[%c0_11, %c0_12] : memref<2x32xf32, #tpu.memory_space<vmem>>, vector<2x32xf32>
      tpu.vector_store %arg9[%c0_11, %c0_12], %12 {strides = array<i32>} : memref<2x32xf32, #tpu.memory_space<vmem>>, vector<2x32xf32>,
    } else {
    }
    %c0 = arith.constant 0 : index
    %c0_1 = arith.constant 0 : index
    %3 = vector.load %arg9[%c0, %c0_1] : memref<2x32xf32, #tpu.memory_space<vmem>>, vector<2x32xf32>
    %c0_2 = arith.constant 0 : index
    %c0_3 = arith.constant 0 : index
    %4 = vector.load %arg3[%c0_2, %c0_3] : memref<2x72xbf16, #tpu.memory_space<vmem>>, vector<2x72xbf16>
    %c0_4 = arith.constant 0 : index
    %c0_5 = arith.constant 0 : index
    %5 = vector.load %arg4[%c0_4, %c0_5] : memref<72x32xbf16, #tpu.memory_space<vmem>>, vector<72x32xbf16>
    %cst = arith.constant dense<0.000000e+00> : vector<2x32xf32>
    %6 = tpu.matmul %4, %5, %cst {dimension_numbers = #tpu.dot_dimension_numbers<[1], [0], [0], [1], [0, 0, 1, 1], [], []>} : vector<2x72xbf16>, vector<72x32xbf16>, vector<2x32xf32> -> vector<2x32xf32>
    %7 = arith.addf %3, %6 : vector<2x32xf32>
    %c0_6 = arith.constant 0 : index
    %c0_7 = arith.constant 0 : index
    %8 = vector.load %arg9[%c0_6, %c0_7] : memref<2x32xf32, #tpu.memory_space<vmem>>, vector<2x32xf32>
    tpu.vector_store %arg9[%c0_6, %c0_7], %7 {strides = array<i32>} : memref<2x32xf32, #tpu.memory_space<vmem>>, vector<2x32xf32>,
    %c0_i32_8 = arith.constant 0 : i32
    %9 = arith.cmpi eq, %arg2, %c0_i32_8 : i32
    %10 = arith.extui %9 : i1 to i32
    %c0_i32_9 = arith.constant 0 : i32
    %11 = arith.cmpi ne, %10, %c0_i32_9 : i32
    scf.if %11 {
      %c0_10 = arith.constant 0 : index
      %c0_11 = arith.constant 0 : index
      %12 = vector.load %arg9[%c0_10, %c0_11] : memref<2x32xf32, #tpu.memory_space<vmem>>, vector<2x32xf32>
      %c0_12 = arith.constant 0 : index
      %c0_13 = arith.constant 0 : index
      %13 = vector.load %arg5[%c0_12, %c0_13] : memref<1x32xf32, #tpu.memory_space<vmem>>, vector<1x32xf32>
      %14 = vector.broadcast %13 : vector<1x32xf32> to vector<2x32xf32>
      %15 = arith.addf %12, %14 : vector<2x32xf32>
      %cst_14 = arith.constant dense<0.000000e+00> : vector<32xf32>
      %16 = vector.multi_reduction <add>, %15, %cst_14 [0] : vector<2x32xf32> to vector<32xf32>
      %17 = vector.shape_cast %16 : vector<32xf32> to vector<1x32xf32>
      %cst_15 = arith.constant 2.000000e+00 : f32
      %18 = vector.broadcast %cst_15 : f32 to vector<1x32xf32>
      %19 = arith.divf %17, %18 : vector<1x32xf32>
      %20 = vector.broadcast %19 : vector<1x32xf32> to vector<2x32xf32>
      %21 = arith.subf %15, %20 : vector<2x32xf32>
      %22 = vector.broadcast %19 : vector<1x32xf32> to vector<2x32xf32>
      %23 = arith.subf %15, %22 : vector<2x32xf32>
      %24 = arith.mulf %21, %23 : vector<2x32xf32>
      %cst_16 = arith.constant dense<0.000000e+00> : vector<32xf32>
      %25 = vector.multi_reduction <add>, %24, %cst_16 [0] : vector<2x32xf32> to vector<32xf32>
      %26 = vector.shape_cast %25 : vector<32xf32> to vector<1x32xf32>
      %cst_17 = arith.constant 2.000000e+00 : f32
      %27 = vector.broadcast %cst_17 : f32 to vector<1x32xf32>
      %28 = arith.divf %26, %27 : vector<1x32xf32>
      %29 = vector.broadcast %19 : vector<1x32xf32> to vector<2x32xf32>
      %30 = arith.subf %15, %29 : vector<2x32xf32>
      %cst_18 = arith.constant 9.99999974E-6 : f32
      %31 = vector.broadcast %cst_18 : f32 to vector<1x32xf32>
      %32 = arith.addf %28, %31 : vector<1x32xf32>
      %33 = math.rsqrt %32 : vector<1x32xf32>
      %34 = vector.broadcast %33 : vector<1x32xf32> to vector<2x32xf32>
      %35 = arith.mulf %30, %34 : vector<2x32xf32>
      %c0_19 = arith.constant 0 : index
      %c0_20 = arith.constant 0 : index
      %36 = vector.load %arg6[%c0_19, %c0_20] : memref<1x32xf32, #tpu.memory_space<vmem>>, vector<1x32xf32>
      %37 = vector.broadcast %36 : vector<1x32xf32> to vector<2x32xf32>
      %38 = arith.mulf %35, %37 : vector<2x32xf32>
      %c0_21 = arith.constant 0 : index
      %c0_22 = arith.constant 0 : index
      %39 = vector.load %arg7[%c0_21, %c0_22] : memref<1x32xf32, #tpu.memory_space<vmem>>, vector<1x32xf32>
      %40 = vector.broadcast %39 : vector<1x32xf32> to vector<2x32xf32>
      %41 = arith.addf %38, %40 : vector<2x32xf32>
      %cst_23 = arith.constant 0.000000e+00 : f32
      %42 = vector.broadcast %cst_23 : f32 to vector<2x32xf32>
      %43 = arith.cmpf ogt, %41, %42 : vector<2x32xf32>
      %cst_24 = arith.constant 2.000000e-01 : f32
      %44 = vector.broadcast %cst_24 : f32 to vector<2x32xf32>
      %45 = arith.mulf %44, %41 : vector<2x32xf32>
      %46 = arith.select %43, %41, %45 : vector<2x32xi1>, vector<2x32xf32>
      %47 = arith.truncf %46 : vector<2x32xf32> to vector<2x32xbf16>
      %c0_25 = arith.constant 0 : index
      %c0_26 = arith.constant 0 : index
      %48 = vector.load %arg8[%c0_25, %c0_26] : memref<2x32xbf16, #tpu.memory_space<vmem>>, vector<2x32xbf16>
      tpu.vector_store %arg8[%c0_25, %c0_26], %47 {strides = array<i32>} : memref<2x32xbf16, #tpu.memory_space<vmem>>, vector<2x32xbf16>,
    } else {
    }
    return
  }
  func.func @transform_0(%arg0: i32, %arg1: i32, %arg2: i32) -> (i32, i32) {
    %c0_i32 = arith.constant 0 : i32
    return %arg0, %arg2 : i32, i32
  }
  func.func @transform_1(%arg0: i32, %arg1: i32, %arg2: i32) -> (i32, i32) {
    %c0_i32 = arith.constant 0 : i32
    return %arg2, %arg1 : i32, i32
  }
  func.func @transform_2(%arg0: i32, %arg1: i32, %arg2: i32) -> (i32, i32) {
    %c0_i32 = arith.constant 0 : i32
    %c0_i32_0 = arith.constant 0 : i32
    return %c0_i32, %arg1 : i32, i32
  }
  func.func @transform_3(%arg0: i32, %arg1: i32, %arg2: i32) -> (i32, i32) {
    %c0_i32 = arith.constant 0 : i32
    %c0_i32_0 = arith.constant 0 : i32
    return %c0_i32, %arg1 : i32, i32
  }
  func.func @transform_4(%arg0: i32, %arg1: i32, %arg2: i32) -> (i32, i32) {
    %c0_i32 = arith.constant 0 : i32
    %c0_i32_0 = arith.constant 0 : i32
    return %c0_i32, %arg1 : i32, i32
  }
  func.func @transform_5(%arg0: i32, %arg1: i32, %arg2: i32) -> (i32, i32) {
    %c0_i32 = arith.constant 0 : i32
    return %arg0, %arg1 : i32, i32
  }
}

module attributes {stable_mosaic.version = 11 : i64} {
  func.func @_matmul_bn_lrelu_kernel(%arg0: i32, %arg1: i32, %arg2: i32, %arg3: memref<2x288xbf16, #tpu.memory_space<vmem>>, %arg4: memref<288x64xbf16, #tpu.memory_space<vmem>>, %arg5: memref<1x64xf32, #tpu.memory_space<vmem>>, %arg6: memref<1x64xf32, #tpu.memory_space<vmem>>, %arg7: memref<1x64xf32, #tpu.memory_space<vmem>>, %arg8: memref<2x64xbf16, #tpu.memory_space<vmem>>, %arg9: memref<2x64xf32, #tpu.memory_space<vmem>>) attributes {dimension_semantics = [#tpu.dimension_semantics<parallel>, #tpu.dimension_semantics<parallel>, #tpu.dimension_semantics<arbitrary>], iteration_bounds = array<i64: 1, 1, 1>, scalar_prefetch = 0 : i64, scratch_operands = 1 : i64, tpu.core_type = #tpu.core_type<tc>, window_params = [{transform_indices = @transform_0, window_bounds = array<i64: 2, 288>}, {transform_indices = @transform_1, window_bounds = array<i64: 288, 64>}, {transform_indices = @transform_2, window_bounds = array<i64: 1, 64>}, {transform_indices = @transform_3, window_bounds = array<i64: 1, 64>}, {transform_indices = @transform_4, window_bounds = array<i64: 1, 64>}, {transform_indices = @transform_5, window_bounds = array<i64: 2, 64>}]} {
    %c0_i32 = arith.constant 0 : i32
    %0 = arith.cmpi eq, %arg2, %c0_i32 : i32
    %1 = arith.extui %0 : i1 to i32
    %c0_i32_0 = arith.constant 0 : i32
    %2 = arith.cmpi ne, %1, %c0_i32_0 : i32
    scf.if %2 {
      %cst_10 = arith.constant 0.000000e+00 : f32
      %12 = vector.broadcast %cst_10 : f32 to vector<2x64xf32>
      %c0_11 = arith.constant 0 : index
      %c0_12 = arith.constant 0 : index
      %13 = vector.load %arg9[%c0_11, %c0_12] : memref<2x64xf32, #tpu.memory_space<vmem>>, vector<2x64xf32>
      tpu.vector_store %arg9[%c0_11, %c0_12], %12 {strides = array<i32>} : memref<2x64xf32, #tpu.memory_space<vmem>>, vector<2x64xf32>,
    } else {
    }
    %c0 = arith.constant 0 : index
    %c0_1 = arith.constant 0 : index
    %3 = vector.load %arg9[%c0, %c0_1] : memref<2x64xf32, #tpu.memory_space<vmem>>, vector<2x64xf32>
    %c0_2 = arith.constant 0 : index
    %c0_3 = arith.constant 0 : index
    %4 = vector.load %arg3[%c0_2, %c0_3] : memref<2x288xbf16, #tpu.memory_space<vmem>>, vector<2x288xbf16>
    %c0_4 = arith.constant 0 : index
    %c0_5 = arith.constant 0 : index
    %5 = vector.load %arg4[%c0_4, %c0_5] : memref<288x64xbf16, #tpu.memory_space<vmem>>, vector<288x64xbf16>
    %cst = arith.constant dense<0.000000e+00> : vector<2x64xf32>
    %6 = tpu.matmul %4, %5, %cst {dimension_numbers = #tpu.dot_dimension_numbers<[1], [0], [0], [1], [0, 0, 1, 1], [], []>} : vector<2x288xbf16>, vector<288x64xbf16>, vector<2x64xf32> -> vector<2x64xf32>
    %7 = arith.addf %3, %6 : vector<2x64xf32>
    %c0_6 = arith.constant 0 : index
    %c0_7 = arith.constant 0 : index
    %8 = vector.load %arg9[%c0_6, %c0_7] : memref<2x64xf32, #tpu.memory_space<vmem>>, vector<2x64xf32>
    tpu.vector_store %arg9[%c0_6, %c0_7], %7 {strides = array<i32>} : memref<2x64xf32, #tpu.memory_space<vmem>>, vector<2x64xf32>,
    %c0_i32_8 = arith.constant 0 : i32
    %9 = arith.cmpi eq, %arg2, %c0_i32_8 : i32
    %10 = arith.extui %9 : i1 to i32
    %c0_i32_9 = arith.constant 0 : i32
    %11 = arith.cmpi ne, %10, %c0_i32_9 : i32
    scf.if %11 {
      %c0_10 = arith.constant 0 : index
      %c0_11 = arith.constant 0 : index
      %12 = vector.load %arg9[%c0_10, %c0_11] : memref<2x64xf32, #tpu.memory_space<vmem>>, vector<2x64xf32>
      %c0_12 = arith.constant 0 : index
      %c0_13 = arith.constant 0 : index
      %13 = vector.load %arg5[%c0_12, %c0_13] : memref<1x64xf32, #tpu.memory_space<vmem>>, vector<1x64xf32>
      %14 = vector.broadcast %13 : vector<1x64xf32> to vector<2x64xf32>
      %15 = arith.addf %12, %14 : vector<2x64xf32>
      %cst_14 = arith.constant dense<0.000000e+00> : vector<64xf32>
      %16 = vector.multi_reduction <add>, %15, %cst_14 [0] : vector<2x64xf32> to vector<64xf32>
      %17 = vector.shape_cast %16 : vector<64xf32> to vector<1x64xf32>
      %cst_15 = arith.constant 2.000000e+00 : f32
      %18 = vector.broadcast %cst_15 : f32 to vector<1x64xf32>
      %19 = arith.divf %17, %18 : vector<1x64xf32>
      %20 = vector.broadcast %19 : vector<1x64xf32> to vector<2x64xf32>
      %21 = arith.subf %15, %20 : vector<2x64xf32>
      %22 = vector.broadcast %19 : vector<1x64xf32> to vector<2x64xf32>
      %23 = arith.subf %15, %22 : vector<2x64xf32>
      %24 = arith.mulf %21, %23 : vector<2x64xf32>
      %cst_16 = arith.constant dense<0.000000e+00> : vector<64xf32>
      %25 = vector.multi_reduction <add>, %24, %cst_16 [0] : vector<2x64xf32> to vector<64xf32>
      %26 = vector.shape_cast %25 : vector<64xf32> to vector<1x64xf32>
      %cst_17 = arith.constant 2.000000e+00 : f32
      %27 = vector.broadcast %cst_17 : f32 to vector<1x64xf32>
      %28 = arith.divf %26, %27 : vector<1x64xf32>
      %29 = vector.broadcast %19 : vector<1x64xf32> to vector<2x64xf32>
      %30 = arith.subf %15, %29 : vector<2x64xf32>
      %cst_18 = arith.constant 9.99999974E-6 : f32
      %31 = vector.broadcast %cst_18 : f32 to vector<1x64xf32>
      %32 = arith.addf %28, %31 : vector<1x64xf32>
      %33 = math.rsqrt %32 : vector<1x64xf32>
      %34 = vector.broadcast %33 : vector<1x64xf32> to vector<2x64xf32>
      %35 = arith.mulf %30, %34 : vector<2x64xf32>
      %c0_19 = arith.constant 0 : index
      %c0_20 = arith.constant 0 : index
      %36 = vector.load %arg6[%c0_19, %c0_20] : memref<1x64xf32, #tpu.memory_space<vmem>>, vector<1x64xf32>
      %37 = vector.broadcast %36 : vector<1x64xf32> to vector<2x64xf32>
      %38 = arith.mulf %35, %37 : vector<2x64xf32>
      %c0_21 = arith.constant 0 : index
      %c0_22 = arith.constant 0 : index
      %39 = vector.load %arg7[%c0_21, %c0_22] : memref<1x64xf32, #tpu.memory_space<vmem>>, vector<1x64xf32>
      %40 = vector.broadcast %39 : vector<1x64xf32> to vector<2x64xf32>
      %41 = arith.addf %38, %40 : vector<2x64xf32>
      %cst_23 = arith.constant 0.000000e+00 : f32
      %42 = vector.broadcast %cst_23 : f32 to vector<2x64xf32>
      %43 = arith.cmpf ogt, %41, %42 : vector<2x64xf32>
      %cst_24 = arith.constant 2.000000e-01 : f32
      %44 = vector.broadcast %cst_24 : f32 to vector<2x64xf32>
      %45 = arith.mulf %44, %41 : vector<2x64xf32>
      %46 = arith.select %43, %41, %45 : vector<2x64xi1>, vector<2x64xf32>
      %47 = arith.truncf %46 : vector<2x64xf32> to vector<2x64xbf16>
      %c0_25 = arith.constant 0 : index
      %c0_26 = arith.constant 0 : index
      %48 = vector.load %arg8[%c0_25, %c0_26] : memref<2x64xbf16, #tpu.memory_space<vmem>>, vector<2x64xbf16>
      tpu.vector_store %arg8[%c0_25, %c0_26], %47 {strides = array<i32>} : memref<2x64xbf16, #tpu.memory_space<vmem>>, vector<2x64xbf16>,
    } else {
    }
    return
  }
  func.func @transform_0(%arg0: i32, %arg1: i32, %arg2: i32) -> (i32, i32) {
    %c0_i32 = arith.constant 0 : i32
    return %arg0, %arg2 : i32, i32
  }
  func.func @transform_1(%arg0: i32, %arg1: i32, %arg2: i32) -> (i32, i32) {
    %c0_i32 = arith.constant 0 : i32
    return %arg2, %arg1 : i32, i32
  }
  func.func @transform_2(%arg0: i32, %arg1: i32, %arg2: i32) -> (i32, i32) {
    %c0_i32 = arith.constant 0 : i32
    %c0_i32_0 = arith.constant 0 : i32
    return %c0_i32, %arg1 : i32, i32
  }
  func.func @transform_3(%arg0: i32, %arg1: i32, %arg2: i32) -> (i32, i32) {
    %c0_i32 = arith.constant 0 : i32
    %c0_i32_0 = arith.constant 0 : i32
    return %c0_i32, %arg1 : i32, i32
  }
  func.func @transform_4(%arg0: i32, %arg1: i32, %arg2: i32) -> (i32, i32) {
    %c0_i32 = arith.constant 0 : i32
    %c0_i32_0 = arith.constant 0 : i32
    return %c0_i32, %arg1 : i32, i32
  }
  func.func @transform_5(%arg0: i32, %arg1: i32, %arg2: i32) -> (i32, i32) {
    %c0_i32 = arith.constant 0 : i32
    return %arg0, %arg1 : i32, i32
  }
}

module attributes {stable_mosaic.version = 11 : i64} {
  func.func @_matmul_kernel(%arg0: i32, %arg1: i32, %arg2: i32, %arg3: memref<2x64xbf16, #tpu.memory_space<vmem>>, %arg4: memref<64x64xbf16, #tpu.memory_space<vmem>>, %arg5: memref<1x64xf32, #tpu.memory_space<vmem>>, %arg6: memref<2x64xf32, #tpu.memory_space<vmem>>, %arg7: memref<2x64xf32, #tpu.memory_space<vmem>>) attributes {dimension_semantics = [#tpu.dimension_semantics<parallel>, #tpu.dimension_semantics<parallel>, #tpu.dimension_semantics<arbitrary>], iteration_bounds = array<i64: 1, 1, 1>, scalar_prefetch = 0 : i64, scratch_operands = 1 : i64, tpu.core_type = #tpu.core_type<tc>, window_params = [{transform_indices = @transform_0, window_bounds = array<i64: 2, 64>}, {transform_indices = @transform_1, window_bounds = array<i64: 64, 64>}, {transform_indices = @transform_2, window_bounds = array<i64: 1, 64>}, {transform_indices = @transform_3, window_bounds = array<i64: 2, 64>}]} {
    %c0_i32 = arith.constant 0 : i32
    %0 = arith.cmpi eq, %arg2, %c0_i32 : i32
    %1 = arith.extui %0 : i1 to i32
    %c0_i32_0 = arith.constant 0 : i32
    %2 = arith.cmpi ne, %1, %c0_i32_0 : i32
    scf.if %2 {
      %cst_10 = arith.constant 0.000000e+00 : f32
      %12 = vector.broadcast %cst_10 : f32 to vector<2x64xf32>
      %c0_11 = arith.constant 0 : index
      %c0_12 = arith.constant 0 : index
      %13 = vector.load %arg7[%c0_11, %c0_12] : memref<2x64xf32, #tpu.memory_space<vmem>>, vector<2x64xf32>
      tpu.vector_store %arg7[%c0_11, %c0_12], %12 {strides = array<i32>} : memref<2x64xf32, #tpu.memory_space<vmem>>, vector<2x64xf32>,
    } else {
    }
    %c0 = arith.constant 0 : index
    %c0_1 = arith.constant 0 : index
    %3 = vector.load %arg7[%c0, %c0_1] : memref<2x64xf32, #tpu.memory_space<vmem>>, vector<2x64xf32>
    %c0_2 = arith.constant 0 : index
    %c0_3 = arith.constant 0 : index
    %4 = vector.load %arg3[%c0_2, %c0_3] : memref<2x64xbf16, #tpu.memory_space<vmem>>, vector<2x64xbf16>
    %c0_4 = arith.constant 0 : index
    %c0_5 = arith.constant 0 : index
    %5 = vector.load %arg4[%c0_4, %c0_5] : memref<64x64xbf16, #tpu.memory_space<vmem>>, vector<64x64xbf16>
    %cst = arith.constant dense<0.000000e+00> : vector<2x64xf32>
    %6 = tpu.matmul %4, %5, %cst {dimension_numbers = #tpu.dot_dimension_numbers<[1], [0], [0], [1], [0, 0, 1, 1], [], []>} : vector<2x64xbf16>, vector<64x64xbf16>, vector<2x64xf32> -> vector<2x64xf32>
    %7 = arith.addf %3, %6 : vector<2x64xf32>
    %c0_6 = arith.constant 0 : index
    %c0_7 = arith.constant 0 : index
    %8 = vector.load %arg7[%c0_6, %c0_7] : memref<2x64xf32, #tpu.memory_space<vmem>>, vector<2x64xf32>
    tpu.vector_store %arg7[%c0_6, %c0_7], %7 {strides = array<i32>} : memref<2x64xf32, #tpu.memory_space<vmem>>, vector<2x64xf32>,
    %c0_i32_8 = arith.constant 0 : i32
    %9 = arith.cmpi eq, %arg2, %c0_i32_8 : i32
    %10 = arith.extui %9 : i1 to i32
    %c0_i32_9 = arith.constant 0 : i32
    %11 = arith.cmpi ne, %10, %c0_i32_9 : i32
    scf.if %11 {
      %c0_10 = arith.constant 0 : index
      %c0_11 = arith.constant 0 : index
      %12 = vector.load %arg7[%c0_10, %c0_11] : memref<2x64xf32, #tpu.memory_space<vmem>>, vector<2x64xf32>
      %c0_12 = arith.constant 0 : index
      %c0_13 = arith.constant 0 : index
      %13 = vector.load %arg5[%c0_12, %c0_13] : memref<1x64xf32, #tpu.memory_space<vmem>>, vector<1x64xf32>
      %14 = vector.broadcast %13 : vector<1x64xf32> to vector<2x64xf32>
      %15 = arith.addf %12, %14 : vector<2x64xf32>
      %cst_14 = arith.constant 0.000000e+00 : f32
      %16 = vector.broadcast %cst_14 : f32 to vector<2x64xf32>
      %17 = arith.subf %16, %15 : vector<2x64xf32>
      %18 = math.exp %17 : vector<2x64xf32>
      %cst_15 = arith.constant 1.000000e+00 : f32
      %19 = vector.broadcast %cst_15 : f32 to vector<2x64xf32>
      %20 = arith.addf %19, %18 : vector<2x64xf32>
      %cst_16 = arith.constant 1.000000e+00 : f32
      %21 = vector.broadcast %cst_16 : f32 to vector<2x64xf32>
      %22 = arith.divf %21, %20 : vector<2x64xf32>
      %c0_17 = arith.constant 0 : index
      %c0_18 = arith.constant 0 : index
      %23 = vector.load %arg6[%c0_17, %c0_18] : memref<2x64xf32, #tpu.memory_space<vmem>>, vector<2x64xf32>
      tpu.vector_store %arg6[%c0_17, %c0_18], %22 {strides = array<i32>} : memref<2x64xf32, #tpu.memory_space<vmem>>, vector<2x64xf32>,
    } else {
    }
    return
  }
  func.func @transform_0(%arg0: i32, %arg1: i32, %arg2: i32) -> (i32, i32) {
    %c0_i32 = arith.constant 0 : i32
    return %arg0, %arg2 : i32, i32
  }
  func.func @transform_1(%arg0: i32, %arg1: i32, %arg2: i32) -> (i32, i32) {
    %c0_i32 = arith.constant 0 : i32
    return %arg2, %arg1 : i32, i32
  }
  func.func @transform_2(%arg0: i32, %arg1: i32, %arg2: i32) -> (i32, i32) {
    %c0_i32 = arith.constant 0 : i32
    %c0_i32_0 = arith.constant 0 : i32
    return %c0_i32, %arg1 : i32, i32
  }
  func.func @transform_3(%arg0: i32, %arg1: i32, %arg2: i32) -> (i32, i32) {
    %c0_i32 = arith.constant 0 : i32
    return %arg0, %arg1 : i32, i32
  }
}

</mosaic_0001>

<bundles_post_ra>
// kernel: discriminator_forward.4
= control target key start
LH: loop header
LB: loop body
LE: loop exit
PB: predicated region body
PF: predicated region fallthrough
CT: control target
= control target key end

     0   :  { %vm19_vm0 = vcmask 64512   ;;  %v168_v1 = vmov 0.0   ;;  %vm69_vm1 = vcmask 1041408   ;;  %vm62_vm2 = vcmask 293888   ;;  %s231_s1 = inlined_call_operand.vmem [shape: bf16[36,8], index: 1, kind: input, shape index: {}]   ;;  %s232_s2 = inlined_call_operand.vmem [shape: f32[1,8], index: 2, kind: input, shape index: {}]   ;;  %s233_s0 = inlined_call_operand.vmem [shape: bf16[32,36], index: 0, kind: input, shape index: {}]   ;;  %s234_s3 = inlined_call_operand.vmem [shape: bf16[32,8], index: 3, kind: output, shape index: {}]  }
   0x1   :  { %v36_v0 = vld [vmem:[%s231_s1 + $0x10] sm:$0x3]  ;;  %20 = vst.msk [vmem:[#allocation2] sm:$0xff] %vm19_vm0, %v168_v1  ;;  %v162_v5 = vld [vmem:[%s231_s1 + $0x8] sm:$0xff]  ;;  %v161_v6 = vld [vmem:[%s231_s1] sm:$0xff]  ;;  %vm132_vm5 = vcmask 60416  }
   0x2   :  { %v56_v2 = vunpack.c.l.b16 %v36_v0  ;;  %21 = vst.msk [vmem:[#allocation2 + $0x8] sm:$0xff] %vm19_vm0, %v168_v1  ;;  %v159_v7 = vld [vmem:[%s233_s0] sm:$0xff]  ;;  %v160_v8 = vld [vmem:[%s233_s0 + $0x8] sm:$0xff] }
   0x3   :  { %22 = vst.msk [vmem:[#allocation2 + $0x10] sm:$0xff] %vm19_vm0, %v168_v1  ;;  %v167_v17 = vld [vmem:[%s232_s2] ss:$0 sm:$0xff] }
   0x4   :  { %v59_v3 = vpack.c.b16 %v56_v2, %v56_v2  ;;  %23 = vst.msk [vmem:[#allocation2 + $0x18] sm:$0xff] %vm19_vm0, %v168_v1 }
   0x6   :  { %v71_v4 = vsel %vm69_vm1, %v59_v3, 0 }
   0x7   :  { %78 = vmatpush.bf16.msra.mxu0 %v71_v4  ;;  %163 = vmatpush.bf16.msra.mxu1 %v71_v4 }
   0x8   :  { %v24_v9 = vld [vmem:[#allocation2] sm:$0xff] }
   0x9   :  { %v25_v15 = vld [vmem:[#allocation2 + $0x8] sm:$0xff] }
   0xa   :  { %v26_v10 = vld [vmem:[#allocation2 + $0x10] sm:$0xff] }
   0xb   :  { %79 = vmatpush.bf16.msra.mxu0 %v162_v5  ;;  %164 = vmatpush.bf16.msra.mxu1 %v162_v5  ;;  %v27_v16 = vld [vmem:[#allocation2 + $0x18] sm:$0xff] }
   0xf   :  { %80 = vmatpush.bf16.msra.mxu0 %v161_v6  ;;  %165 = vmatpush.bf16.msra.mxu1 %v161_v6 }
  0x12   :  { %157 = vmatmul.msk.bf16.vlgmr.msra.gmra.mxu0 %vm62_vm2, %v159_v7  ;;  %158 = vmatmul.msk.bf16.vlgmr.msra.gmra.mxu1 %vm62_vm2, %v160_v8 }
  0x8f   :  { %v82_v11 = vpop.f32.mrf.mxu0  ;;  %v87_v12 = vpop.f32.mrf.mxu1 }
  0x90   :  { %v92_v13 = vadd.f32 %v82_v11, %v24_v9  ;;  %v94_v14 = vadd.f32 %v87_v12, %v26_v10 }
  0x92   :  { %97 = vst.msk [vmem:[#allocation2] sm:$0xff] %vm19_vm0, %v92_v13 }
  0x93   :  { %99 = vst.msk [vmem:[#allocation2 + $0x10] sm:$0xff] %vm19_vm0, %v94_v14 }
  0x97   :  { %v84_v18 = vpop.f32.mrf.mxu0  ;;  %v89_v19 = vpop.f32.mrf.mxu1 }
  0x98   :  { %v93_v20 = vadd.f32 %v84_v18, %v25_v15  ;;  %v95_v21 = vadd.f32 %v89_v19, %v27_v16 }
  0x99   :  { %v104_v22 = vld [vmem:[#allocation2] sm:$0xff] }
  0x9a   :  { %v112_v23 = vadd.f32 %v167_v17, %v104_v22  ;;  %v106_v24 = vld [vmem:[#allocation2 + $0x10] sm:$0xff]  ;;  %98 = vst.msk [vmem:[#allocation2 + $0x8] sm:$0xff] %vm19_vm0, %v93_v20 }
  0x9b   :  { %v114_v25 = vadd.f32 %v167_v17, %v106_v24  ;;  %100 = vst.msk [vmem:[#allocation2 + $0x18] sm:$0xff] %vm19_vm0, %v95_v21 }
  0x9c   :  { %vm116_vm3 = vcmp.gt.f32.partialorder %v112_v23, 0.0  ;;  %v120_v26 = vmul.f32 0.2, %v112_v23 }
  0x9d   :  { %vm118_vm4 = vcmp.gt.f32.partialorder %v114_v25, 0.0  ;;  %v122_v27 = vmul.f32 0.2, %v114_v25 }
  0x9e   :  { %v124_v28 = vsel %vm116_vm3, %v112_v23, %v120_v26 }
  0x9f   :  { %v128_v29 = vpack.c.bf16 %v124_v28, %v124_v28  ;;  %v126_v30 = vsel %vm118_vm4, %v114_v25, %v122_v27 }
  0xa0   :  { %v130_v31 = vpack.c.bf16 %v126_v30, %v126_v30 }
  0xa1   :  { %133 = vst.msk [vmem:[%s234_s3] sm:$0xf] %vm132_vm5, %v128_v29  ;;  %v105_v32 = vld [vmem:[#allocation2 + $0x8] sm:$0xff] }
  0xa2   :  { %135 = vst.msk [vmem:[%s234_s3 + $0x8] sm:$0xf] %vm132_vm5, %v130_v31  ;;  %v113_v33 = vadd.f32 %v167_v17, %v105_v32  ;;  %v107_v34 = vld [vmem:[#allocation2 + $0x18] sm:$0xff] }
  0xa3   :  { %v115_v35 = vadd.f32 %v167_v17, %v107_v34 }
  0xa4   :  { %vm117_vm6 = vcmp.gt.f32.partialorder %v113_v33, 0.0  ;;  %v121_v36 = vmul.f32 0.2, %v113_v33 }
  0xa5   :  { %vm119_vm7 = vcmp.gt.f32.partialorder %v115_v35, 0.0  ;;  %v123_v37 = vmul.f32 0.2, %v115_v35 }
  0xa6   :  { %v125_v38 = vsel %vm117_vm6, %v113_v33, %v121_v36 }
  0xa7   :  { %v129_v39 = vpack.c.bf16 %v125_v38, %v125_v38  ;;  %v127_v40 = vsel %vm119_vm7, %v115_v35, %v123_v37 }
  0xa8   :  { %v131_v41 = vpack.c.bf16 %v127_v40, %v127_v40 }
  0xa9   :  { %134 = vst.msk [vmem:[%s234_s3 + $0x4] sm:$0xf] %vm132_vm5, %v129_v39 }
  0xaa   :  { %136 = vst.msk [vmem:[%s234_s3 + $0xc] sm:$0xf] %vm132_vm5, %v131_v41 }

// kernel: discriminator_forward.5
= control target key start
LH: loop header
LB: loop body
LE: loop exit
PB: predicated region body
PF: predicated region fallthrough
CT: control target
= control target key end

     0   :  { %vm25_vm0 = vcmask 254976   ;;  %v185_v1 = vmov 0.0   ;;  %vm69_vm1 = vcmask 1043456   ;;  %vm65_vm2 = vcmask 588800   ;;  %s251_s1 = inlined_call_operand.vmem [shape: bf16[72,32], index: 1, kind: input, shape index: {}]   ;;  %s252_s2 = inlined_call_operand.vmem [shape: f32[1,32], index: 2, kind: input, shape index: {}]   ;;  %s253_s3 = inlined_call_operand.vmem [shape: f32[1,32], index: 3, kind: input, shape index: {}]   ;;  %s254_s4 = inlined_call_operand.vmem [shape: f32[1,32], index: 4, kind: input, shape index: {}]   ;;  %s255_s0 = inlined_call_operand.vmem [shape: bf16[2,72], index: 0, kind: input, shape index: {}]   ;;  %s256_s5 = inlined_call_operand.vmem [shape: bf16[2,32], index: 5, kind: output, shape index: {}]  }
   0x1   :  { %v37_v0 = vld [vmem:[%s251_s1 + $0x20] sm:$0xf]  ;;  %26 = vst.msk [vmem:[#allocation2] sm:$0x3] %vm25_vm0, %v185_v1  ;;  %v175_v5 = vld [vmem:[%s251_s1 + $0x18] sm:$0xff]  ;;  %v174_v6 = vld [vmem:[%s251_s1 + $0x10] sm:$0xff] }
   0x2   :  { %v55_v2 = vunpack.c.l.b16 %v37_v0  ;;  %v173_v7 = vld [vmem:[%s251_s1 + $0x8] sm:$0xff]  ;;  %v172_v8 = vld [vmem:[%s251_s1] sm:$0xff]  ;;  %v186_v11 = vmov 2.0   ;;  %vm149_vm8 = vcmask 253952  }
   0x3   :  { %v28_v9 = vld [vmem:[%s255_s0] sm:$0x1]  ;;  %181 = vrcp.f32 %v186_v11 }
   0x4   :  { %v60_v3 = vpack.c.b16 %v55_v2, %v55_v2  ;;  %v178_v15 = vld [vmem:[%s252_s2] ss:$0 sm:$0xff] }
   0x5   :  { %v179_v49 = vld [vmem:[%s253_s3] ss:$0 sm:$0xff] }
   0x6   :  { %v71_v4 = vsel %vm69_vm1, %v60_v3, 0  ;;  %v180_v52 = vld [vmem:[%s254_s4] ss:$0 sm:$0xff] }
   0x7   :  { %76 = vmatpush.bf16.msra.mxu0 %v71_v4 }
   0x8   :  { %v27_v10 = vld [vmem:[#allocation2] sm:$0x3] }
   0x9   :  { %v182_v14 = vpop.eup %181 }
   0xa   :  { %v106_v16 = vmul.f32 2.0, %v182_v14  ;;  %vm110_vm3 = vweird.f32 %v182_v14 }
   0xb   :  { %77 = vmatpush.bf16.msra.mxu0 %v175_v5 }
   0xc   :  { %v107_v20 = vsub.f32 1.0, %v106_v16 }
   0xe   :  { %v108_v23 = vmul.f32 %v182_v14, %v107_v20 }
   0xf   :  { %78 = vmatpush.bf16.msra.mxu0 %v174_v6 }
  0x10   :  { %v109_v26 = vadd.f32 %v182_v14, %v108_v23 }
  0x12   :  { %v111_v29 = vsel %vm110_vm3, %v182_v14, %v109_v26 }
  0x13   :  { %79 = vmatpush.bf16.msra.mxu0 %v173_v7 }
  0x17   :  { %80 = vmatpush.bf16.msra.mxu0 %v172_v8 }
  0x1a   :  { %171 = vmatmul.msk.bf16.vlgmr.msra.gmra.mxu0 %vm65_vm2, %v28_v9 }
  0x97   :  { %v82_v12 = vpop.f32.mrf.mxu0 }
  0x98   :  { %v86_v13 = vadd.f32 %v82_v12, %v27_v10 }
  0x9a   :  { %88 = vst.msk [vmem:[#allocation2] sm:$0x3] %vm25_vm0, %v86_v13 }
  0x9f   :  { %v84_v17 = vpop.f32.mrf.mxu0 }
  0xa1   :  { %v92_v18 = vld [vmem:[#allocation2] sm:$0x3] }
  0xa2   :  { %v97_v19 = vadd.f32 %v178_v15, %v92_v18 }
  0xa4   :  { %v98_v21 = vsel %vm25_vm0, %v97_v19, 0.0 }
  0xa5   :  { %v99_v22 = vrot.slane %v98_v21, 4 }
  0xa7   :  { %v100_v24 = vadd.f32 %v99_v22, %v98_v21 }
  0xa9   :  { %v101_v25 = vrot.slane %v100_v24, 2 }
  0xab   :  { %v102_v27 = vadd.f32 %v101_v25, %v100_v24 }
  0xad   :  { %v103_v28 = vrot.slane %v102_v27, 1 }
  0xaf   :  { %v104_v30 = vadd.f32 %v103_v28, %v102_v27 }
  0xb1   :  { %v112_v31 = vmul.f32 %v111_v29, %v104_v30 }
  0xb3   :  { %v113_v32 = vsub.f32 %v97_v19, %v112_v31 }
  0xb5   :  { %v114_v33 = vmul.f32 %v113_v32, %v113_v32 }
  0xb7   :  { %v115_v34 = vsel %vm25_vm0, %v114_v33, 0.0 }
  0xb8   :  { %v116_v35 = vrot.slane %v115_v34, 4 }
  0xba   :  { %v117_v36 = vadd.f32 %v116_v35, %v115_v34 }
  0xbc   :  { %v118_v37 = vrot.slane %v117_v36, 2 }
  0xbe   :  { %v119_v38 = vadd.f32 %v118_v37, %v117_v36 }
  0xc0   :  { %v120_v39 = vrot.slane %v119_v38, 1 }
  0xc2   :  { %v121_v40 = vadd.f32 %v120_v39, %v119_v38 }
  0xc4   :  { %v122_v41 = vmul.f32 %v121_v40, %v111_v29 }
  0xc6   :  { %v123_v42 = vadd.f32 1e-05, %v122_v41 }
  0xc8   :  { %183 = vrsqrt.f32 %v123_v42  ;;  %vm130_vm5 = vweird.f32 %v123_v42 }
  0xce   :  { %v184_v43 = vpop.eup %183 }
  0xcf   :  { %v125_v44 = vmul.f32 %v184_v43, %v123_v42  ;;  %vm131_vm4 = vweird.f32 %v184_v43 }
  0xd0   :  { %vm132_vm6 = vmor %vm130_vm5, %vm131_vm4 }
  0xd1   :  { %v126_v45 = vmul.f32 %v184_v43, %v125_v44 }
  0xd3   :  { %v127_v46 = vmul.f32 0.5, %v126_v45 }
  0xd5   :  { %v128_v47 = vsub.f32 1.5, %v127_v46 }
  0xd7   :  { %v129_v48 = vmul.f32 %v184_v43, %v128_v47 }
  0xd9   :  { %v133_v50 = vsel %vm132_vm6, %v184_v43, %v129_v48 }
  0xda   :  { %v134_v51 = vmul.f32 %v133_v50, %v113_v32 }
  0xdc   :  { %v139_v53 = vmul.f32 %v179_v49, %v134_v51 }
  0xde   :  { %v144_v54 = vadd.f32 %v180_v52, %v139_v53 }
  0xe0   :  { %vm145_vm7 = vcmp.gt.f32.partialorder %v144_v54, 0.0  ;;  %v146_v55 = vmul.f32 0.2, %v144_v54 }
  0xe2   :  { %v147_v56 = vsel %vm145_vm7, %v144_v54, %v146_v55 }
  0xe3   :  { %v148_v57 = vpack.c.bf16 %v147_v56, %v147_v56 }
  0xe5   :  { %150 = vst.msk [vmem:[%s256_s5] sm:$0x1] %vm149_vm8, %v148_v57 }

// kernel: discriminator_forward.7
= control target key start
LH: loop header
LB: loop body
LE: loop exit
PB: predicated region body
PF: predicated region fallthrough
CT: control target
= control target key end

     0   :  { %vm20_vm0 = vcmask 517120   ;;  %v175_v1 = vmov 0.0   ;;  %s221_s0 = inlined_call_operand.vmem [shape: bf16[2,64], index: 0, kind: input, shape index: {}]   ;;  %s222_s1 = inlined_call_operand.vmem [shape: bf16[64,64], index: 1, kind: input, shape index: {}]   ;;  %s223_s2 = inlined_call_operand.vmem [shape: f32[1,64], index: 2, kind: input, shape index: {}]   ;;  %s224_s3 = inlined_call_operand.hbm [shape: f32[2,64], index: 3, kind: output, shape index: {}]  }
   0x1   :  { %v141_v0 = vld [vmem:[%s222_s1 + $0x18] sm:$0xff]  ;;  %21 = vst.msk [vmem:[#allocation2] sm:$0x3] %vm20_vm0, %v175_v1  ;;  %v140_v2 = vld [vmem:[%s222_s1 + $0x10] sm:$0xff] }
   0x2   :  { %64 = vmatpush.bf16.msra.mxu0 %v141_v0 }
   0x3   :  { %8 = vsyncpa [#allocation4], 0  ;;  %v139_v3 = vld [vmem:[%s222_s1 + $0x8] sm:$0xff]  ;;  %v138_v4 = vld [vmem:[%s222_s1] sm:$0xff]  ;;  %vm56_vm1 = vcmask 523264   ;;  %s112_s25 = sshll.u32 %s224_s3, 4  ;;  %s113_s25 = int_to_ptr.hbm [resolvable:$true] %s112_s25 }
   0x4   :  { %v23_v5 = vld [vmem:[%s221_s0] sm:$0x1]  ;;  %s176_s0 = smov [#allocation3]  }
   0x5   :  { %v144_v9 = vld [vmem:[%s223_s2] ss:$0 sm:$0xff]  ;;  %s110_s1 = sshll.u32 %s176_s0, 4  ;;  %s111_s1 = int_to_ptr.vmem [resolvable:$true] %s110_s1 }
   0x6   :  { %65 = vmatpush.bf16.msra.mxu0 %v140_v2 }
   0x8   :  { %v22_v6 = vld [vmem:[#allocation2] sm:$0x3] }
   0xa   :  { %66 = vmatpush.bf16.msra.mxu0 %v139_v3 }
   0xe   :  { %67 = vmatpush.bf16.msra.mxu0 %v138_v4 }
  0x11   :  { %137 = vmatmul.msk.bf16.vlgmr.msra.gmra.mxu0 %vm56_vm1, %v23_v5 }
  0x8e   :  { %v69_v7 = vpop.f32.mrf.mxu0 }
  0x8f   :  { %v73_v8 = vadd.f32 %v69_v7, %v22_v6 }
  0x91   :  { %75 = vst.msk [vmem:[#allocation2] sm:$0x3] %vm20_vm0, %v73_v8 }
  0x96   :  { %v71_v10 = vpop.f32.mrf.mxu0 }
  0x98   :  { %v79_v11 = vld [vmem:[#allocation2] sm:$0x3] }
  0x99   :  { %v84_v12 = vadd.f32 %v144_v9, %v79_v11 }
  0x9b   :  { %v85_v13 = vsub.f32 0.0, %v84_v12 }
  0x9d   :  { %v86_v14 = vmul.f32 1.442695, %v85_v13 }
  0x9f   :  { %145 = vpow2.f32 %v86_v14 }
  0xa5   :  { %v146_v15 = vpop.eup %145 }
  0xa6   :  { %v88_v16 = vadd.f32 1.0, %v146_v15 }
  0xa8   :  { %147 = vrcp.f32 %v88_v16  ;;  %v100_v20 = vand.u32 2147483648, %v88_v16  ;;  %v98_v22 = vand.u32 2147483647, %v88_v16  ;;  %vm94_vm3 = vweird.f32 %v88_v16 }
  0xaa   :  { %v101_v24 = vor.u32 1.1754944e-38, %v100_v20  ;;  %vm99_vm5 = vcmp.eq.f32.partialorder %v98_v22, 8.507059e+37 }
  0xae   :  { %v148_v17 = vpop.eup %147 }
  0xaf   :  { %v90_v18 = vmul.f32 %v148_v17, %v88_v16  ;;  %vm95_vm2 = vweird.f32 %v148_v17 }
  0xb0   :  { %vm96_vm4 = vmor %vm94_vm3, %vm95_vm2 }
  0xb1   :  { %v91_v19 = vsub.f32 1.0, %v90_v18 }
  0xb3   :  { %v92_v21 = vmul.f32 %v148_v17, %v91_v19 }
  0xb5   :  { %v93_v23 = vadd.f32 %v148_v17, %v92_v21 }
  0xb7   :  { %v97_v25 = vsel %vm96_vm4, %v148_v17, %v93_v23 }
  0xb8   :  { %v102_v26 = vsel %vm99_vm5, %v101_v24, %v97_v25 }
  0xb9   :  { %104 = vst.msk [vmem:[#allocation3] sm:$0x3] %vm20_vm0, %v102_v26 }
  0xba   :  { %115 = dma.vmem_to_hbm [thread:$0]  %s111_s1, 32, %s113_s25, [#allocation4]  }
  0xbb   :  { %173 = dma.done.wait [#allocation4], 32  }
  0xbc   :  { %174 = vsyncadd [#allocation4], 4294967264 }
  0xbd   :  { %120 = vsyncpa [#allocation4], 1 }

// kernel: discriminator_forward.6
= control target key start
LH: loop header
LB: loop body
LE: loop exit
PB: predicated region body
PF: predicated region fallthrough
CT: control target
= control target key end

     0   :  { %vm180_vm0 = vcmask 261120   ;;  %vm25_vm1 = vcmask 517120   ;;  %v391_v22 = vmov 0.0   ;;  %v392_v29 = vmov 2.0   ;;  %s496_s1 = inlined_call_operand.vmem [shape: bf16[288,64], index: 1, kind: input, shape index: {}]   ;;  %s497_s0 = inlined_call_operand.vmem [shape: bf16[2,288], index: 0, kind: input, shape index: {}]   ;;  %s498_s2 = inlined_call_operand.vmem [shape: f32[1,64], index: 2, kind: input, shape index: {}]   ;;  %s499_s3 = inlined_call_operand.vmem [shape: f32[1,64], index: 3, kind: input, shape index: {}]   ;;  %s500_s4 = inlined_call_operand.vmem [shape: f32[1,64], index: 4, kind: input, shape index: {}]   ;;  %s501_s5 = inlined_call_operand.vmem [shape: bf16[2,64], index: 5, kind: output, shape index: {}]  }
   0x1   :  { %v371_v0 = vld [vmem:[%s496_s1 + $0x38] sm:$0xff]  ;;  %v370_v2 = vld [vmem:[%s496_s1 + $0x30] sm:$0xff]  ;;  %v381_v4 = vld [vmem:[%s496_s1 + $0x88] sm:$0xff]  ;;  %26 = vst.msk [vmem:[#allocation2] sm:$0x3] %vm25_vm1, %v391_v22  ;;  %387 = vrcp.f32 %v392_v29  ;;  %vm285_vm7 = vcmask 516096  }
   0x2   :  { %v379_v1 = vld [vmem:[%s496_s1 + $0x78] sm:$0xff]  ;;  %183 = vmatpush.bf16.msra.mxu0 %v371_v0  ;;  %v378_v3 = vld [vmem:[%s496_s1 + $0x70] sm:$0xff]  ;;  %215 = vmatpush.bf16.msra.mxu2 %v381_v4  ;;  %v380_v5 = vld [vmem:[%s496_s1 + $0x80] sm:$0xff] }
   0x3   :  { %196 = vmatpush.bf16.msra.mxu1 %v379_v1  ;;  %v28_v6 = vld [vmem:[%s497_s0] sm:$0x7]  ;;  %v369_v7 = vld [vmem:[%s496_s1 + $0x28] sm:$0xff]  ;;  %v367_v12 = vld [vmem:[%s496_s1 + $0x18] sm:$0xff] }
   0x4   :  { %66 = vst [vmem:[#allocation1] ss:$9 sm:$0xff] %v28_v6  ;;  %v377_v8 = vld [vmem:[%s496_s1 + $0x68] sm:$0xff]  ;;  %v368_v9 = vld [vmem:[%s496_s1 + $0x20] sm:$0xff]  ;;  %v375_v13 = vld [vmem:[%s496_s1 + $0x58] sm:$0xff] }
   0x5   :  { %v376_v10 = vld [vmem:[%s496_s1 + $0x60] sm:$0xff]  ;;  %v366_v14 = vld [vmem:[%s496_s1 + $0x10] sm:$0xff]  ;;  %v365_v16 = vld [vmem:[%s496_s1 + $0x8] sm:$0xff] }
   0x6   :  { %184 = vmatpush.bf16.msra.mxu0 %v370_v2  ;;  %216 = vmatpush.bf16.msra.mxu2 %v380_v5  ;;  %v374_v15 = vld [vmem:[%s496_s1 + $0x50] sm:$0xff]  ;;  %v373_v17 = vld [vmem:[%s496_s1 + $0x48] sm:$0xff]  ;;  %v364_v18 = vld [vmem:[%s496_s1] sm:$0xff] }
   0x7   :  { %197 = vmatpush.bf16.msra.mxu1 %v378_v3  ;;  %v372_v19 = vld [vmem:[%s496_s1 + $0x40] sm:$0xff]  ;;  %v388_v32 = vpop.eup %387 }
   0x8   :  { %v27_v28 = vld [vmem:[#allocation2] sm:$0x3]  ;;  %v384_v35 = vld [vmem:[%s498_s2] ss:$0 sm:$0xff]  ;;  %v242_v36 = vmul.f32 2.0, %v388_v32  ;;  %vm246_vm2 = vweird.f32 %v388_v32 }
   0x9   :  { %v385_v4 = vld [vmem:[%s499_s3] ss:$0 sm:$0xff] }
   0xa   :  { %185 = vmatpush.bf16.msra.mxu0 %v369_v7  ;;  %v243_v39 = vsub.f32 1.0, %v242_v36  ;;  %v386_v7 = vld [vmem:[%s500_s4] ss:$0 sm:$0xff] }
   0xb   :  { %198 = vmatpush.bf16.msra.mxu1 %v377_v8  ;;  %v69_v11 = vld [vmem:[#allocation1 + $0x12] sm:$0xff]  ;;  %v67_v20 = vld [vmem:[#allocation1] sm:$0xff]  ;;  %v68_v21 = vld [vmem:[#allocation1 + $0x9] sm:$0xff] }
   0xc   :  { %363 = vmatmul.msk.bf16.vlgmr.msra.gmra.mxu2 %vm180_vm0, %v69_v11  ;;  %v244_v42 = vmul.f32 %v388_v32, %v243_v39 }
   0xe   :  { %186 = vmatpush.bf16.msra.mxu0 %v368_v9  ;;  %v245_v45 = vadd.f32 %v388_v32, %v244_v42 }
   0xf   :  { %199 = vmatpush.bf16.msra.mxu1 %v376_v10 }
  0x10   :  { %v247_v48 = vsel %vm246_vm2, %v388_v32, %v245_v45 }
  0x12   :  { %187 = vmatpush.bf16.msra.mxu0 %v367_v12 }
  0x13   :  { %200 = vmatpush.bf16.msra.mxu1 %v375_v13 }
  0x16   :  { %188 = vmatpush.bf16.msra.mxu0 %v366_v14 }
  0x17   :  { %201 = vmatpush.bf16.msra.mxu1 %v374_v15 }
  0x1a   :  { %189 = vmatpush.bf16.msra.mxu0 %v365_v16 }
  0x1b   :  { %202 = vmatpush.bf16.msra.mxu1 %v373_v17 }
  0x1e   :  { %190 = vmatpush.bf16.msra.mxu0 %v364_v18 }
  0x1f   :  { %203 = vmatpush.bf16.msra.mxu1 %v372_v19 }
  0x21   :  { %191 = vmatmul.bf16.vlgmr.msra.gmra.mxu0 %v67_v20 }
  0x22   :  { %204 = vmatmul.bf16.vlgmr.msra.gmra.mxu1 %v68_v21 }
  0x8f   :  { %v218_v23 = vpop.f32.mrf.mxu2 }
  0x97   :  { %v220_v24 = vpop.f32.mrf.mxu2 }
  0x9e   :  { %v192_v25 = vpop.f32.mrf.mxu0 }
  0x9f   :  { %v205_v26 = vpop.f32.mrf.mxu1 }
  0xa0   :  { %v206_v27 = vadd.f32 %v205_v26, %v192_v25 }
  0xa2   :  { %v219_v30 = vadd.f32 %v218_v23, %v206_v27 }
  0xa4   :  { %v222_v31 = vadd.f32 %v219_v30, %v27_v28 }
  0xa6   :  { %224 = vst.msk [vmem:[#allocation2] sm:$0x3] %vm25_vm1, %v222_v31  ;;  %v194_v33 = vpop.f32.mrf.mxu0 }
  0xa7   :  { %v207_v34 = vpop.f32.mrf.mxu1 }
  0xad   :  { %v228_v37 = vld [vmem:[#allocation2] sm:$0x3] }
  0xae   :  { %v233_v38 = vadd.f32 %v384_v35, %v228_v37 }
  0xb0   :  { %v234_v40 = vsel %vm25_vm1, %v233_v38, 0.0 }
  0xb1   :  { %v235_v41 = vrot.slane %v234_v40, 4 }
  0xb3   :  { %v236_v43 = vadd.f32 %v235_v41, %v234_v40 }
  0xb5   :  { %v237_v44 = vrot.slane %v236_v43, 2 }
  0xb7   :  { %v238_v46 = vadd.f32 %v237_v44, %v236_v43 }
  0xb9   :  { %v239_v47 = vrot.slane %v238_v46, 1 }
  0xbb   :  { %v240_v49 = vadd.f32 %v239_v47, %v238_v46 }
  0xbd   :  { %v248_v50 = vmul.f32 %v247_v48, %v240_v49 }
  0xbf   :  { %v249_v51 = vsub.f32 %v233_v38, %v248_v50 }
  0xc1   :  { %v250_v52 = vmul.f32 %v249_v51, %v249_v51 }
  0xc3   :  { %v251_v53 = vsel %vm25_vm1, %v250_v52, 0.0 }
  0xc4   :  { %v252_v54 = vrot.slane %v251_v53, 4 }
  0xc6   :  { %v253_v55 = vadd.f32 %v252_v54, %v251_v53 }
  0xc8   :  { %v254_v56 = vrot.slane %v253_v55, 2 }
  0xca   :  { %v255_v57 = vadd.f32 %v254_v56, %v253_v55 }
  0xcc   :  { %v256_v58 = vrot.slane %v255_v57, 1 }
  0xce   :  { %v257_v59 = vadd.f32 %v256_v58, %v255_v57 }
  0xd0   :  { %v258_v60 = vmul.f32 %v257_v59, %v247_v48 }
  0xd2   :  { %v259_v61 = vadd.f32 1e-05, %v258_v60 }
  0xd4   :  { %389 = vrsqrt.f32 %v259_v61  ;;  %vm266_vm4 = vweird.f32 %v259_v61 }
  0xda   :  { %v390_v62 = vpop.eup %389 }
  0xdb   :  { %v261_v63 = vmul.f32 %v390_v62, %v259_v61  ;;  %vm267_vm3 = vweird.f32 %v390_v62 }
  0xdc   :  { %vm268_vm5 = vmor %vm266_vm4, %vm267_vm3 }
  0xdd   :  { %v262_v0 = vmul.f32 %v390_v62, %v261_v63 }
  0xdf   :  { %v263_v1 = vmul.f32 0.5, %v262_v0 }
  0xe1   :  { %v264_v2 = vsub.f32 1.5, %v263_v1 }
  0xe3   :  { %v265_v3 = vmul.f32 %v390_v62, %v264_v2 }
  0xe5   :  { %v269_v5 = vsel %vm268_vm5, %v390_v62, %v265_v3 }
  0xe6   :  { %v270_v6 = vmul.f32 %v269_v5, %v249_v51 }
  0xe8   :  { %v275_v8 = vmul.f32 %v385_v4, %v270_v6 }
  0xea   :  { %v280_v9 = vadd.f32 %v386_v7, %v275_v8 }
  0xec   :  { %vm281_vm6 = vcmp.gt.f32.partialorder %v280_v9, 0.0  ;;  %v282_v10 = vmul.f32 0.2, %v280_v9 }
  0xee   :  { %v283_v11 = vsel %vm281_vm6, %v280_v9, %v282_v10 }
  0xef   :  { %v284_v12 = vpack.c.bf16 %v283_v11, %v283_v11 }
  0xf1   :  { %286 = vst.msk [vmem:[%s501_s5] sm:$0x1] %vm285_vm7, %v284_v12 }

</bundles_post_ra>
